<compile_context>
chip_gen: v5e
topology: v5e:2x2
jax: 0.10.0
libtpu: 0.0.40
codegen_flags: <defaults>
</compile_context>

<pallas_src>
import functools

import jax
import jax.numpy as jnp
from jax.experimental import pallas as pl
from jax.experimental.pallas import tpu as pltpu


def _round_up(x, m):
    return ((x + m - 1) // m) * m


def _cdiv(a, b):
    return (a + b - 1) // b


def _vmem_capacity_bytes():
    """Per-core VMEM capacity; conservative fallback if the query fails."""
    try:
        cap = getattr(pltpu.get_tpu_info(), "vmem_capacity_bytes", None)
        if cap:
            return int(cap)
    except Exception:
        pass
    return 64 << 20  # v7x per-TC VMEM; safe lower bound for v5e/v6e too


def _hidden_tile_candidates(hidden):
    """Divisors of `hidden` that are multiples of 128, descending (or [hidden])."""
    if hidden <= 128 or hidden % 128 != 0:
        return [hidden]
    return [d for d in range(hidden, 127, -128) if hidden % d == 0]


def mlp_kernel(x_ref, w1_ref, b1_ref, w2_ref, b2_ref, o_ref, acc_ref,
               *, compute_dtype):
    """One (tm x th) step of the fused expand -> GELU -> proj MLP.

    Grid = (M tiles, hidden tiles). The hidden axis is the reduction axis of
    the proj matmul; partial sums live in a resident f32 VMEM accumulator.
    """
    j = pl.program_id(1)

    # expand: (tm, E) @ (E, th) -> f32 on the MXU. Operands are cast to the
    # compute dtype in-kernel (cheap VPU work hidden under the MXU), so the
    # wrapper never writes extra HBM copies of x / the weights.
    x = x_ref[...].astype(compute_dtype)
    h = jnp.dot(x, w1_ref[...].astype(compute_dtype),
                preferred_element_type=jnp.float32)
    h = h + b1_ref[...]

    # GELU, tanh approximation (matches F.gelu(x, approximate='tanh')).
    # Kept in f32: correct on v5e (no bf16 VALU/EUP) and tighter numerics.
    # TODO(synk): on v6e/v7x the bias-add + GELU could run in bf16 to halve
    # VPU/EUP element count when n_embd is small.
    c = 0.7978845608028654  # sqrt(2/pi)
    h = 0.5 * h * (1.0 + jnp.tanh(c * (h + 0.044715 * h * h * h)))

    # proj partial sum: (tm, th) @ (th, E), f32 accumulation.
    partial = jnp.dot(h.astype(compute_dtype), w2_ref[...].astype(compute_dtype),
                      preferred_element_type=jnp.float32)

    # Write-on-first-step: no zero-init store, no accumulator read on step 0.
    @pl.when(j == 0)
    def _first():
        acc_ref[...] = partial

    @pl.when(j != 0)
    def _accumulate():
        acc_ref[...] += partial

    @pl.when(j == pl.num_programs(1) - 1)
    def _finalize():
        # TODO(synk): dropout is identity in eval mode / p=0.0; training-mode
        # dropout would use pltpu.prng_seed + pltpu.prng_random_bits here.
        o_ref[...] = (acc_ref[...] + b2_ref[...]).astype(o_ref.dtype)


@functools.partial(jax.jit, static_argnames=("tm", "th", "compute_dtype"))
def mlp_forward(x, w1, b1, w2, b2, *, tm=512, th=2048,
                compute_dtype=jnp.bfloat16):
    """x: (B, T, n_embd); w1: (n_embd, hidden); w2: (hidden, n_embd).

    Weights are passed pre-transposed to (in_features, out_features) so the
    kernel computes x @ W (PyTorch nn.Linear stores (out, in)). Pass weights
    already stored in `compute_dtype` (e.g. bf16) to avoid any cast traffic.
    """
    B, T, E = x.shape
    H = w1.shape[1]
    out_dtype = x.dtype
    M = B * T

    # Lane-dense padding: matmul dims become multiples of 128 so stores are
    # unmasked and MXU tiles are full (matters for small n_embd).
    E_pad = _round_up(E, 128)
    H_pad = _round_up(H, 128)

    # ---- tile selection ---------------------------------------------------
    mult = 16 if jnp.dtype(compute_dtype).itemsize < 4 else 8
    M_unit = _round_up(M, mult)
    tm_eff = max(mult, min(_round_up(tm, mult), M_unit))
    # Keep >= 2 M tiles where possible so the "parallel" axis can shard across
    # TensorCores (v7x megacore); only when each half is still a real tile.
    if _cdiv(M_unit, tm_eff) == 1 and M_unit >= 2 * mult:
        tm_eff = max(mult, _round_up(_cdiv(M, 2), mult))

    th_cands = _hidden_tile_candidates(H_pad)
    th_idx = len(th_cands) - 1
    for i, d in enumerate(th_cands):
        if d <= max(th, 128):
            th_idx = i
            break
    th_eff = th_cands[th_idx]

    x_sz = jnp.dtype(x.dtype).itemsize
    w1_sz = jnp.dtype(w1.dtype).itemsize
    w2_sz = jnp.dtype(w2.dtype).itemsize
    o_sz = jnp.dtype(out_dtype).itemsize
    c_sz = jnp.dtype(compute_dtype).itemsize
    x_cast = c_sz if x.dtype != compute_dtype else 0
    w1_cast = c_sz if w1.dtype != compute_dtype else 0
    w2_cast = c_sz if w2.dtype != compute_dtype else 0

    def _working_set(tm_, th_):
        # Conservative: double-buffered DMA tiles + in-kernel cast copies +
        # f32 GELU intermediate + its compute-dtype copy + f32 proj partial +
        # resident f32 accumulator.
        return int(
            2 * tm_ * E_pad * x_sz          # x tile (double-buffered)
            + tm_ * E_pad * x_cast          # x cast copy
            + 2 * E_pad * th_ * w1_sz       # w1 tile
            + E_pad * th_ * w1_cast         # w1 cast copy
            + 2 * th_ * E_pad * w2_sz       # w2 tile
            + th_ * E_pad * w2_cast         # w2 cast copy
            + 2 * 8 * th_ * 4               # b1 tile (sublane-padded)
            + 2 * 8 * E_pad * 4             # b2 tile
            + 2 * tm_ * E_pad * o_sz        # out tile
            + tm_ * E_pad * 4               # f32 accumulator scratch
            + tm_ * E_pad * 4               # f32 proj partial
            + tm_ * th_ * 4                 # f32 GELU intermediate
            + tm_ * th_ * c_sz)             # compute-dtype copy fed to dot 2

    cap = _vmem_capacity_bytes()
    budget = int(cap * 0.85)  # headroom for compiler-internal scratch
    while _working_set(tm_eff, th_eff) > budget:
        can_th = th_idx + 1 < len(th_cands)
        can_tm = tm_eff // 2 >= mult
        if can_th and (th_eff >= tm_eff or not can_tm):
            th_idx += 1
            th_eff = th_cands[th_idx]
        elif can_tm:
            tm_eff = max(mult, _round_up(tm_eff // 2, mult))
        else:
            break

    M_pad = _round_up(M, tm_eff)
    grid = (M_pad // tm_eff, H_pad // th_eff)

    # ---- operand layout (zero-pad only; no dtype casts in the wrapper) ----
    x2d = x.reshape(M, E)
    if (M_pad, E_pad) != (M, E):
        x2d = jnp.pad(x2d, ((0, M_pad - M), (0, E_pad - E)))
    w1p = w1
    w2p = w2
    if (E_pad, H_pad) != (E, H):
        w1p = jnp.pad(w1, ((0, E_pad - E), (0, H_pad - H)))
        w2p = jnp.pad(w2, ((0, H_pad - H), (0, E_pad - E)))
    b1_2d = jnp.pad(b1, (0, H_pad - H)).reshape(1, H_pad).astype(jnp.float32)
    b2_2d = jnp.pad(b2, (0, E_pad - E)).reshape(1, E_pad).astype(jnp.float32)

    need = _working_set(tm_eff, th_eff)
    vmem_limit = int(min(budget, max(32 << 20, int(need * 1.25))))

    out2d = pl.pallas_call(
        functools.partial(mlp_kernel, compute_dtype=compute_dtype),
        out_shape=jax.ShapeDtypeStruct((M_pad, E_pad), out_dtype),
        grid_spec=pltpu.PrefetchScalarGridSpec(
            num_scalar_prefetch=0,
            grid=grid,
            in_specs=[
                pl.BlockSpec((tm_eff, E_pad), lambda i, j: (i, 0)),   # x
                pl.BlockSpec((E_pad, th_eff), lambda i, j: (0, j)),   # w1
                pl.BlockSpec((1, th_eff), lambda i, j: (0, j)),       # b1
                pl.BlockSpec((th_eff, E_pad), lambda i, j: (j, 0)),   # w2
                pl.BlockSpec((1, E_pad), lambda i, j: (0, 0)),        # b2
            ],
            out_specs=pl.BlockSpec((tm_eff, E_pad), lambda i, j: (i, 0)),
            scratch_shapes=[pltpu.VMEM((tm_eff, E_pad), jnp.float32)],
        ),
        compiler_params=pltpu.CompilerParams(
            dimension_semantics=("parallel", "arbitrary"),
            vmem_limit_bytes=vmem_limit,
        ),
    )(x2d, w1p, b1_2d, w2p, b2_2d)

    out2d = out2d[:M, :E]
    return out2d.reshape(B, T, E)


def gelu_tanh_ref(x):
    c = 0.7978845608028654
    return 0.5 * x * (1.0 + jnp.tanh(c * (x + 0.044715 * x ** 3)))


if __name__ == "__main__":
    # Config: n_embd=32, mlp_expansion_factor=4, bias=True, dropout=0.0 (eval)
    B, T, n_embd, expansion = 2, 8, 32, 4
    hidden = expansion * n_embd

    key = jax.random.PRNGKey(0)
    kx, kw1, kb1, kw2, kb2 = jax.random.split(key, 5)
    x = jax.random.normal(kx, (B, T, n_embd), dtype=jnp.float32)
    # nn.Linear weights are (out, in); store pre-transposed as (in, out).
    w1 = jax.random.normal(kw1, (n_embd, hidden), dtype=jnp.float32) * 0.02
    b1 = jax.random.normal(kb1, (hidden,), dtype=jnp.float32) * 0.02
    w2 = jax.random.normal(kw2, (hidden, n_embd), dtype=jnp.float32) * 0.02
    b2 = jax.random.normal(kb2, (n_embd,), dtype=jnp.float32) * 0.02

    # Pure-JAX reference.
    ref = gelu_tanh_ref(x @ w1 + b1) @ w2 + b2

    # Exactness check on the f32 compute path.
    out_f32 = mlp_forward(x, w1, b1, w2, b2, compute_dtype=jnp.float32)
    jax.block_until_ready(out_f32)
    assert out_f32.shape == (B, T, n_embd)
    assert jnp.allclose(out_f32, ref, atol=1e-5, rtol=1e-5)

    # Default bf16-MXU path: weights stored persistently in bf16 (cast once
    # outside the forward); activations stay f32 and are cast in-kernel.
    w1_bf16, w2_bf16 = w1.astype(jnp.bfloat16), w2.astype(jnp.bfloat16)
    out_bf16 = mlp_forward(x, w1_bf16, b1, w2_bf16, b2)
    jax.block_until_ready(out_bf16)
    assert out_bf16.shape == (B, T, n_embd)
    assert jnp.allclose(out_bf16, ref, atol=1e-2, rtol=5e-2)

    print("KERNEL_OK")
</pallas_src>

<mosaic_0001>
module attributes {stable_mosaic.version = 11 : i64} {
  func.func @mlp_kernel(%arg0: i32, %arg1: i32, %arg2: memref<8x128xf32, #tpu.memory_space<vmem>>, %arg3: memref<128x128xf32, #tpu.memory_space<vmem>>, %arg4: memref<1x128xf32, #tpu.memory_space<vmem>>, %arg5: memref<128x128xf32, #tpu.memory_space<vmem>>, %arg6: memref<1x128xf32, #tpu.memory_space<vmem>>, %arg7: memref<8x128xf32, #tpu.memory_space<vmem>>, %arg8: memref<8x128xf32, #tpu.memory_space<vmem>>) attributes {dimension_semantics = [#tpu.dimension_semantics<parallel>, #tpu.dimension_semantics<arbitrary>], iteration_bounds = array<i64: 2, 1>, scalar_prefetch = 0 : i64, scratch_operands = 1 : i64, tpu.core_type = #tpu.core_type<tc>, window_params = [{transform_indices = @transform_0, window_bounds = array<i64: 8, 128>}, {transform_indices = @transform_1, window_bounds = array<i64: 128, 128>}, {transform_indices = @transform_2, window_bounds = array<i64: 1, 128>}, {transform_indices = @transform_3, window_bounds = array<i64: 128, 128>}, {pipeline_mode = #tpu.pipeline_mode<synchronous>, transform_indices = @transform_4, window_bounds = array<i64: 1, 128>}, {transform_indices = @transform_5, window_bounds = array<i64: 8, 128>}]} {
    %c0 = arith.constant 0 : index
    %c0_0 = arith.constant 0 : index
    %0 = vector.load %arg2[%c0, %c0_0] : memref<8x128xf32, #tpu.memory_space<vmem>>, vector<8x128xf32>
    %c0_1 = arith.constant 0 : index
    %c0_2 = arith.constant 0 : index
    %1 = vector.load %arg3[%c0_1, %c0_2] : memref<128x128xf32, #tpu.memory_space<vmem>>, vector<128x128xf32>
    %cst = arith.constant dense<0.000000e+00> : vector<8x128xf32>
    %2 = tpu.matmul %0, %1, %cst {dimension_numbers = #tpu.dot_dimension_numbers<[1], [0], [0], [1], [0, 0, 1, 1], [], []>} : vector<8x128xf32>, vector<128x128xf32>, vector<8x128xf32> -> vector<8x128xf32>
    %c0_3 = arith.constant 0 : index
    %c0_4 = arith.constant 0 : index
    %3 = vector.load %arg4[%c0_3, %c0_4] : memref<1x128xf32, #tpu.memory_space<vmem>>, vector<1x128xf32>
    %4 = vector.broadcast %3 : vector<1x128xf32> to vector<8x128xf32>
    %5 = arith.addf %2, %4 : vector<8x128xf32>
    %cst_5 = arith.constant 5.000000e-01 : f32
    %6 = vector.broadcast %cst_5 : f32 to vector<8x128xf32>
    %7 = arith.mulf %6, %5 : vector<8x128xf32>
    %cst_6 = arith.constant 4.471500e-02 : f32
    %8 = vector.broadcast %cst_6 : f32 to vector<8x128xf32>
    %9 = arith.mulf %8, %5 : vector<8x128xf32>
    %10 = arith.mulf %9, %5 : vector<8x128xf32>
    %11 = arith.mulf %10, %5 : vector<8x128xf32>
    %12 = arith.addf %5, %11 : vector<8x128xf32>
    %cst_7 = arith.constant 0.797884583 : f32
    %13 = vector.broadcast %cst_7 : f32 to vector<8x128xf32>
    %14 = arith.mulf %13, %12 : vector<8x128xf32>
    %15 = math.tanh %14 : vector<8x128xf32>
    %cst_8 = arith.constant 1.000000e+00 : f32
    %16 = vector.broadcast %cst_8 : f32 to vector<8x128xf32>
    %17 = arith.addf %16, %15 : vector<8x128xf32>
    %18 = arith.mulf %7, %17 : vector<8x128xf32>
    %c0_9 = arith.constant 0 : index
    %c0_10 = arith.constant 0 : index
    %19 = vector.load %arg5[%c0_9, %c0_10] : memref<128x128xf32, #tpu.memory_space<vmem>>, vector<128x128xf32>
    %cst_11 = arith.constant dense<0.000000e+00> : vector<8x128xf32>
    %20 = tpu.matmul %18, %19, %cst_11 {dimension_numbers = #tpu.dot_dimension_numbers<[1], [0], [0], [1], [0, 0, 1, 1], [], []>} : vector<8x128xf32>, vector<128x128xf32>, vector<8x128xf32> -> vector<8x128xf32>
    %c0_i32 = arith.constant 0 : i32
    %21 = arith.cmpi eq, %arg1, %c0_i32 : i32
    %22 = arith.extui %21 : i1 to i32
    %c0_i32_12 = arith.constant 0 : i32
    %23 = arith.cmpi ne, %22, %c0_i32_12 : i32
    scf.if %23 {
      %c0_17 = arith.constant 0 : index
      %c0_18 = arith.constant 0 : index
      %30 = vector.load %arg8[%c0_17, %c0_18] : memref<8x128xf32, #tpu.memory_space<vmem>>, vector<8x128xf32>
      tpu.vector_store %arg8[%c0_17, %c0_18], %20 {strides = array<i32>} : memref<8x128xf32, #tpu.memory_space<vmem>>, vector<8x128xf32>,
    } else {
    }
    %c0_i32_13 = arith.constant 0 : i32
    %24 = arith.cmpi ne, %arg1, %c0_i32_13 : i32
    %25 = arith.extui %24 : i1 to i32
    %c0_i32_14 = arith.constant 0 : i32
    %26 = arith.cmpi ne, %25, %c0_i32_14 : i32
    scf.if %26 {
      %c0_17 = arith.constant 0 : index
      %c0_18 = arith.constant 0 : index
      %30 = vector.load %arg8[%c0_17, %c0_18] : memref<8x128xf32, #tpu.memory_space<vmem>>, vector<8x128xf32>
      %31 = arith.addf %30, %20 : vector<8x128xf32>
      %c0_19 = arith.constant 0 : index
      %c0_20 = arith.constant 0 : index
      %32 = vector.load %arg8[%c0_19, %c0_20] : memref<8x128xf32, #tpu.memory_space<vmem>>, vector<8x128xf32>
      tpu.vector_store %arg8[%c0_19, %c0_20], %31 {strides = array<i32>} : memref<8x128xf32, #tpu.memory_space<vmem>>, vector<8x128xf32>,
    } else {
    }
    %c0_i32_15 = arith.constant 0 : i32
    %27 = arith.cmpi eq, %arg1, %c0_i32_15 : i32
    %28 = arith.extui %27 : i1 to i32
    %c0_i32_16 = arith.constant 0 : i32
    %29 = arith.cmpi ne, %28, %c0_i32_16 : i32
    scf.if %29 {
      %c0_17 = arith.constant 0 : index
      %c0_18 = arith.constant 0 : index
      %30 = vector.load %arg8[%c0_17, %c0_18] : memref<8x128xf32, #tpu.memory_space<vmem>>, vector<8x128xf32>
      %c0_19 = arith.constant 0 : index
      %c0_20 = arith.constant 0 : index
      %31 = vector.load %arg6[%c0_19, %c0_20] : memref<1x128xf32, #tpu.memory_space<vmem>>, vector<1x128xf32>
      %32 = vector.broadcast %31 : vector<1x128xf32> to vector<8x128xf32>
      %33 = arith.addf %30, %32 : vector<8x128xf32>
      %c0_21 = arith.constant 0 : index
      %c0_22 = arith.constant 0 : index
      %34 = vector.load %arg7[%c0_21, %c0_22] : memref<8x128xf32, #tpu.memory_space<vmem>>, vector<8x128xf32>
      tpu.vector_store %arg7[%c0_21, %c0_22], %33 {strides = array<i32>} : memref<8x128xf32, #tpu.memory_space<vmem>>, vector<8x128xf32>,
    } else {
    }
    return
  }
  func.func @transform_0(%arg0: i32, %arg1: i32) -> (i32, i32) {
    %c0_i32 = arith.constant 0 : i32
    %c0_i32_0 = arith.constant 0 : i32
    return %arg0, %c0_i32 : i32, i32
  }
  func.func @transform_1(%arg0: i32, %arg1: i32) -> (i32, i32) {
    %c0_i32 = arith.constant 0 : i32
    %c0_i32_0 = arith.constant 0 : i32
    return %c0_i32, %arg1 : i32, i32
  }
  func.func @transform_2(%arg0: i32, %arg1: i32) -> (i32, i32) {
    %c0_i32 = arith.constant 0 : i32
    %c0_i32_0 = arith.constant 0 : i32
    return %c0_i32, %arg1 : i32, i32
  }
  func.func @transform_3(%arg0: i32, %arg1: i32) -> (i32, i32) {
    %c0_i32 = arith.constant 0 : i32
    %c0_i32_0 = arith.constant 0 : i32
    return %arg1, %c0_i32 : i32, i32
  }
  func.func @transform_4(%arg0: i32, %arg1: i32) -> (i32, i32) {
    %c0_i32 = arith.constant 0 : i32
    %c0_i32_0 = arith.constant 0 : i32
    %c0_i32_1 = arith.constant 0 : i32
    return %c0_i32, %c0_i32_0 : i32, i32
  }
  func.func @transform_5(%arg0: i32, %arg1: i32) -> (i32, i32) {
    %c0_i32 = arith.constant 0 : i32
    %c0_i32_0 = arith.constant 0 : i32
    return %arg0, %c0_i32 : i32, i32
  }
}

</mosaic_0001>

<bundles_post_ra>
// kernel: mlp_forward.1
= control target key start
LH: loop header
LB: loop body
LE: loop exit
PB: predicated region body
PF: predicated region fallthrough
CT: control target
= control target key end

     0   :  { %s591_s18 = smov 0   ;;  %s593_s19 = smov 0   ;;  %s737_s0 = inlined_call_operand.vmem [shape: f32[16,128], index: 0, kind: input, shape index: {}]   ;;  %s738_s1 = inlined_call_operand.vmem [shape: f32[128,128], index: 1, kind: input, shape index: {}]   ;;  %s739_s2 = inlined_call_operand.vmem [shape: f32[1,128], index: 2, kind: input, shape index: {}]   ;;  %s740_s3 = inlined_call_operand.vmem [shape: f32[128,128], index: 3, kind: input, shape index: {}]   ;;  %s741_s4 = inlined_call_operand.vmem [shape: f32[1,128], index: 4, kind: input, shape index: {}]   ;;  %s742_s5 = inlined_call_operand.vmem [shape: f32[16,128], index: 5, kind: output, shape index: {}]  }
   0x1   :  { %s595_s20 = smov 0  }
   0x2 LB: > { %s27_s21 = sadd.s32 1, %s555_s19  ;;  %p504_p0 = scmp.ge.s32.totalorder %s559_s20, 1  ;;  %s559_s20 = sphi %s595_s20, %s15_s20   ;;  %s555_s19 = sphi %s593_s19, %s744_s19   ;;  %s551_s18 = sphi %s591_s18, %s743_s18  }
   0x3   : > { %p29_p1 = scmp.ge.s32.totalorder %s27_s21, 2  ;;  %p226_p2 = scmp.lt.s32.totalorder %s559_s20, 3 }
   0x5   : > { %s746_s21 = smov (%p29_p1, %s27_s21), 0  ;;  %p227_p3 = pnand %p504_p0, %p226_p2 }
   0x6   : > { %p264_p4 = scmp.lt.s32.totalorder (!%p227_p3), %s551_s18, 1 }
   0x7   : > { %230 = sbr.rel (%p227_p3) target bundleno = 322 (0x142), region = 40 }
   0xc   : > { %v301_v0 = vld [vmem:[%s738_s1 + $0x78] sm:$0xff]  ;;  %v300_v1 = vld [vmem:[%s738_s1 + $0x70] sm:$0xff]  ;;  %v299_v2 = vld [vmem:[%s738_s1 + $0x68] sm:$0xff]  ;;  %s748_s18 = smov (!%p264_p4, %s551_s18), 1 }
   0xd   : > { %306 = vmatpush.msra.mxu0 %v301_v0  ;;  %v298_v3 = vld [vmem:[%s738_s1 + $0x60] sm:$0xff]  ;;  %v350_v4 = vld [vmem:[%s740_s3 + $0x78] sm:$0xff]  ;;  %v349_v5 = vld [vmem:[%s740_s3 + $0x70] sm:$0xff]  ;;  %s505_s10 = sshll.u32 %s748_s18, 3 }
   0xe   : > { %v297_v6 = vld [vmem:[%s738_s1 + $0x58] sm:$0xff]  ;;  %351 = vmatpush.msra.mxu1 %v350_v4  ;;  %v348_v7 = vld [vmem:[%s740_s3 + $0x68] sm:$0xff]  ;;  %v296_v8 = vld [vmem:[%s738_s1 + $0x50] sm:$0xff]  ;;  %s267_s17 = scalar_lea.vmem %s737_s0, %s505_s10  ;;  %s284_s9 = scalar_lea.vmem %s742_s5, %s505_s10 }
   0xf   : > { %307 = vmatpush.msra.mxu0 %v300_v1  ;;  %v347_v9 = vld [vmem:[%s740_s3 + $0x60] sm:$0xff]  ;;  %v295_v10 = vld [vmem:[%s738_s1 + $0x48] sm:$0xff]  ;;  %v293_v12 = vld [vmem:[%s738_s1 + $0x38] sm:$0xff] }
  0x10   : > { %352 = vmatpush.msra.mxu1 %v349_v5  ;;  %v294_v11 = vld [vmem:[%s738_s1 + $0x40] sm:$0xff]  ;;  %v292_v13 = vld [vmem:[%s738_s1 + $0x30] sm:$0xff]  ;;  %v291_v14 = vld [vmem:[%s738_s1 + $0x28] sm:$0xff] }
  0x11   : > { %308 = vmatpush.msra.mxu0 %v299_v2  ;;  %v290_v15 = vld [vmem:[%s738_s1 + $0x20] sm:$0xff]  ;;  %v289_v16 = vld [vmem:[%s738_s1 + $0x18] sm:$0xff]  ;;  %v288_v17 = vld [vmem:[%s738_s1 + $0x10] sm:$0xff] }
  0x12   : > { %353 = vmatpush.msra.mxu1 %v348_v7  ;;  %v287_v18 = vld [vmem:[%s738_s1 + $0x8] sm:$0xff]  ;;  %v286_v19 = vld [vmem:[%s738_s1] sm:$0xff]  ;;  %v346_v21 = vld [vmem:[%s740_s3 + $0x58] sm:$0xff] }
  0x13   : > { %309 = vmatpush.msra.mxu0 %v298_v3  ;;  %v285_v20 = vld [vmem:[%s267_s17] sm:$0xff]  ;;  %v345_v22 = vld [vmem:[%s740_s3 + $0x50] sm:$0xff]  ;;  %v344_v23 = vld [vmem:[%s740_s3 + $0x48] sm:$0xff] }
  0x14   : > { %354 = vmatpush.msra.mxu1 %v347_v9  ;;  %v343_v24 = vld [vmem:[%s740_s3 + $0x40] sm:$0xff]  ;;  %v342_v25 = vld [vmem:[%s740_s3 + $0x38] sm:$0xff]  ;;  %v341_v26 = vld [vmem:[%s740_s3 + $0x30] sm:$0xff] }
  0x15   : > { %310 = vmatpush.msra.mxu0 %v297_v6  ;;  %v340_v27 = vld [vmem:[%s740_s3 + $0x28] sm:$0xff]  ;;  %v339_v28 = vld [vmem:[%s740_s3 + $0x20] sm:$0xff]  ;;  %v338_v29 = vld [vmem:[%s740_s3 + $0x18] sm:$0xff] }
  0x16   : > { %355 = vmatpush.msra.mxu1 %v346_v21  ;;  %v337_v30 = vld [vmem:[%s740_s3 + $0x10] sm:$0xff]  ;;  %v336_v31 = vld [vmem:[%s740_s3 + $0x8] sm:$0xff]  ;;  %v335_v32 = vld [vmem:[%s740_s3] sm:$0xff] }
  0x17   : > { %311 = vmatpush.msra.mxu0 %v296_v8  ;;  %v533_v33 = vld [vmem:[%s739_s2] ss:$0 sm:$0xff] }
  0x18   : > { %356 = vmatpush.msra.mxu1 %v345_v22  ;;  %v534_v45 = vld [vmem:[%s741_s4] ss:$0 sm:$0xff] }
  0x19   : > { %312 = vmatpush.msra.mxu0 %v295_v10 }
  0x1a   : > { %357 = vmatpush.msra.mxu1 %v344_v23 }
  0x1b   : > { %313 = vmatpush.msra.mxu0 %v294_v11 }
  0x1c   : > { %358 = vmatpush.msra.mxu1 %v343_v24 }
  0x1d   : > { %314 = vmatpush.msra.mxu0 %v293_v12 }
  0x1e   : > { %359 = vmatpush.msra.mxu1 %v342_v25 }
  0x1f   : > { %315 = vmatpush.msra.mxu0 %v292_v13 }
  0x20   : > { %360 = vmatpush.msra.mxu1 %v341_v26 }
  0x21   : > { %316 = vmatpush.msra.mxu0 %v291_v14 }
  0x22   : > { %361 = vmatpush.msra.mxu1 %v340_v27 }
  0x23   : > { %317 = vmatpush.msra.mxu0 %v290_v15 }
  0x24   : > { %362 = vmatpush.msra.mxu1 %v339_v28 }
  0x25   : > { %318 = vmatpush.msra.mxu0 %v289_v16 }
  0x26   : > { %363 = vmatpush.msra.mxu1 %v338_v29 }
  0x27   : > { %319 = vmatpush.msra.mxu0 %v288_v17 }
  0x28   : > { %364 = vmatpush.msra.mxu1 %v337_v30 }
  0x29   : > { %320 = vmatpush.msra.mxu0 %v287_v18 }
  0x2a   : > { %365 = vmatpush.msra.mxu1 %v336_v31 }
  0x2b   : > { %321 = vmatpush.msra.mxu0 %v286_v19 }
  0x2c   : > { %322 = vmatmul.f32.vlgmr.msra.gmra.mxu0 %v285_v20  ;;  %366 = vmatpush.msra.mxu1 %v335_v32 }
  0xa9   : > { %v323_v34 = vpop.f32.mrf.mxu0 }
  0xaa   : > { %v324_v35 = vadd.f32 %v533_v33, %v323_v34 }
  0xac   : > { %v327_v36 = vmul.f32 0.044715, %v324_v35  ;;  %v326_v42 = vmul.f32 0.5, %v324_v35 }
  0xae   : > { %v328_v37 = vmul.f32 %v327_v36, %v324_v35 }
  0xb0   : > { %v329_v38 = vmul.f32 %v328_v37, %v324_v35 }
  0xb2   : > { %v330_v39 = vadd.f32 %v329_v38, %v324_v35 }
  0xb4   : > { %v331_v40 = vmul.f32 0.7978846, %v330_v39 }
  0xb6   : > { %535 = vtanh.f32 %v331_v40 }
  0xbc   : > { %v536_v41 = vpop.eup %535 }
  0xbd   : > { %v333_v43 = vadd.f32 1.0, %v536_v41 }
  0xbf   : > { %v334_v44 = vmul.f32 %v333_v43, %v326_v42 }
  0xc1   : > { %367 = vmatmul.f32.vlgmr.msra.gmra.mxu1 %v334_v44 }
 0x13e   : > { %v368_v46 = vpop.f32.mrf.mxu1 }
 0x13f   : > { %v391_v47 = vadd.f32 %v534_v45, %v368_v46 }
 0x141   : > { %392 = vst [vmem:[%s284_s9] sm:$0xff] %v391_v47 }
 0x142 PF: > { %s15_s20 = sadd.s32 1, %s559_s20   ;;  %s743_s18 = smov %s555_s19 }
 0x143   : > { %p12_p5 = scmp.ge.s32.totalorder %s15_s20, 4   ;;  %s744_s19 = smov %s746_s21 }
 0x145   :  { %14 = sbr.rel (!%p12_p5) target bundleno = 2 (0x2), region = 91 }

</bundles_post_ra>
